<compile_context>
chip_gen: v5e
topology: v5e:2x2
jax: 0.10.0
libtpu: 0.0.40
codegen_flags: <defaults>
</compile_context>

<pallas_src>
import math

import jax
import jax.numpy as jnp
from jax.experimental import pallas as pl
from jax.experimental.pallas import tpu as pltpu


def _fit_tile(dim, target):
    """Use `target` if it evenly divides `dim`, else fall back to the full dim."""
    return target if (dim > target and dim % target == 0) else dim


# ----------------------------------------------------------------------------
# Kernel 1: tiled linear layer  (out = x @ W + b)
# ----------------------------------------------------------------------------
def _linear_kernel(x_ref, w_ref, b_ref, o_ref, acc_ref):
    @pl.when(pl.program_id(2) == 0)
    def _init():
        acc_ref[...] = jnp.zeros_like(acc_ref)

    acc_ref[...] += jnp.dot(x_ref[...], w_ref[...],
                            preferred_element_type=jnp.float32)

    @pl.when(pl.program_id(2) == pl.num_programs(2) - 1)
    def _finalize():
        o_ref[...] = (acc_ref[...] + b_ref[...]).astype(o_ref.dtype)


def pallas_linear(x2d, w, b, *, tm=256, tn=256, tk=512):
    """x2d: (M, K) f32, w: (K, N), b: (N,) -> (M, N) f32."""
    M, K = x2d.shape
    N = w.shape[1]
    tm, tn, tk = _fit_tile(M, tm), _fit_tile(N, tn), _fit_tile(K, tk)
    grid = (M // tm, N // tn, K // tk)
    return pl.pallas_call(
        _linear_kernel,
        out_shape=jax.ShapeDtypeStruct((M, N), jnp.float32),
        grid=grid,
        in_specs=[
            pl.BlockSpec((tm, tk), lambda i, j, k: (i, k)),
            pl.BlockSpec((tk, tn), lambda i, j, k: (k, j)),
            pl.BlockSpec((1, tn), lambda i, j, k: (0, j)),
        ],
        out_specs=pl.BlockSpec((tm, tn), lambda i, j, k: (i, j)),
        scratch_shapes=[pltpu.VMEM((tm, tn), jnp.float32)],
        compiler_params=pltpu.CompilerParams(
            dimension_semantics=("parallel", "parallel", "arbitrary")),
    )(x2d, w, b.reshape(1, N))


# ----------------------------------------------------------------------------
# Kernel 2: multi-head scaled-dot-product attention fused with the output
# projection.  Per program: one batch element, one query tile, ALL heads
# (head split is done with static in-VMEM slices so HBM traffic stays
# lane-dense H*dd wide), then ctx @ Wo + bo in VMEM.
# ----------------------------------------------------------------------------
def _make_attn_kernel(num_head, dd_hidden):
    inv_sqrt_dk = 1.0 / math.sqrt(dd_hidden)

    def attn_kernel(q_ref, k_ref, v_ref, wo_ref, bo_ref, o_ref, p_ref):
        # q_ref: (tq, H*dd)   k_ref, v_ref: (S, H*dd)
        # wo_ref: (H*dd, D)   bo_ref: (1, D)
        # o_ref: (tq, D)      p_ref: (H, tq, S)
        outs = []
        for h in range(num_head):
            sl = slice(h * dd_hidden, (h + 1) * dd_hidden)
            # Pre-scale q (tq, dd) rather than the (tq, S) score matrix.
            q = q_ref[:, sl] * inv_sqrt_dk            # (tq, dd)
            k = k_ref[:, sl]                          # (S, dd)
            v = v_ref[:, sl]                          # (S, dd)
            # q @ k^T without materializing a transpose (contract over dd).
            s = jax.lax.dot_general(
                q, k, (((1,), (1,)), ((), ())),
                preferred_element_type=jnp.float32)   # (tq, S)
            m = jnp.max(s, axis=-1, keepdims=True)
            e = jnp.exp(s - m)
            denom = jnp.sum(e, axis=-1, keepdims=True)
            p = e * pl.reciprocal(denom, approx=True)
            # TODO(synk): mask / training-mode dropout would be applied to `p` here.
            p_ref[h] = p.astype(p_ref.dtype)
            outs.append(jnp.dot(p, v, preferred_element_type=jnp.float32))
        # Concatenated heads (tq, H*dd) stay in VMEM; fused output projection.
        ctx = jnp.concatenate(outs, axis=-1)
        o_ref[...] = (jnp.dot(ctx, wo_ref[...],
                              preferred_element_type=jnp.float32)
                      + bo_ref[...]).astype(o_ref.dtype)

    return attn_kernel


def pallas_attention_proj(q, k, v, wo, bo, num_head, dd_hidden, *, tq=256):
    """q, k, v: (B, S, H*dd); wo: (H*dd, D); bo: (D,)
       -> (output (B, S, D), attn (B, H, S, S))."""
    B, S, HD = q.shape
    D = wo.shape[1]
    tq = _fit_tile(S, tq)
    grid = (B, S // tq)
    q_spec = pl.BlockSpec((None, tq, HD), lambda b, qi: (b, qi, 0))
    kv_spec = pl.BlockSpec((None, S, HD), lambda b, qi: (b, 0, 0))
    wo_spec = pl.BlockSpec((HD, D), lambda b, qi: (0, 0))
    bo_spec = pl.BlockSpec((1, D), lambda b, qi: (0, 0))
    return pl.pallas_call(
        _make_attn_kernel(num_head, dd_hidden),
        out_shape=(
            jax.ShapeDtypeStruct((B, S, D), jnp.float32),
            jax.ShapeDtypeStruct((B, num_head, S, S), jnp.float32),
        ),
        grid=grid,
        in_specs=[q_spec, kv_spec, kv_spec, wo_spec, bo_spec],
        out_specs=(
            pl.BlockSpec((None, tq, D), lambda b, qi: (b, qi, 0)),
            pl.BlockSpec((None, num_head, tq, S), lambda b, qi: (b, 0, qi, 0)),
        ),
        compiler_params=pltpu.CompilerParams(
            dimension_semantics=("parallel", "parallel")),
    )(q, k, v, wo, bo.reshape(1, D))


# ----------------------------------------------------------------------------
# MultiHeadAttention forward (glue in plain JAX, hot paths in Pallas).
# ----------------------------------------------------------------------------
def multi_head_attention(params, query, key, value, num_head, dd_hidden):
    B, S, D = query.shape
    HD = num_head * dd_hidden
    Wq, bq, Wk, bk, Wv, bv, Wo, bo = params

    if (key is query) and (value is query):
        # Self-attention fast path: one fused QKV matmul, x read from HBM once.
        W_qkv = jnp.concatenate([Wq, Wk, Wv], axis=1)      # (D, 3*HD)
        b_qkv = jnp.concatenate([bq, bk, bv])              # (3*HD,)
        qkv = pallas_linear(query.reshape(B * S, D), W_qkv, b_qkv)
        q2d = qkv[:, :HD]
        k2d = qkv[:, HD:2 * HD]
        v2d = qkv[:, 2 * HD:]
    else:
        q2d = pallas_linear(query.reshape(B * S, D), Wq, bq)
        k2d = pallas_linear(key.reshape(B * S, D), Wk, bk)
        v2d = pallas_linear(value.reshape(B * S, D), Wv, bv)

    q = q2d.reshape(B, S, HD)
    k = k2d.reshape(B, S, HD)
    v = v2d.reshape(B, S, HD)

    # Attention + LinearFinal fused in one kernel; the (B,S,H*dd) context
    # never touches HBM.  The concatenated-head layout is equivalent to
    # PyTorch's transpose(1,2).contiguous().view(...).
    out, attn = pallas_attention_proj(q, k, v, Wo, bo, num_head, dd_hidden)
    return out, attn


# ----------------------------------------------------------------------------
# Deterministic parameter init (mimics nn.Linear's uniform(+-1/sqrt(fan_in))).
# Weights stored as (in, out) for the x @ W convention.
# ----------------------------------------------------------------------------
def init_params(key, d_model, dd_hidden, num_head):
    h = num_head * dd_hidden
    layer_shapes = [(d_model, h), (d_model, h), (d_model, h), (h, d_model)]
    keys = jax.random.split(key, 2 * len(layer_shapes))
    params = []
    for idx, (fan_in, fan_out) in enumerate(layer_shapes):
        bound = 1.0 / math.sqrt(fan_in)
        params.append(jax.random.uniform(
            keys[2 * idx], (fan_in, fan_out), jnp.float32, -bound, bound))
        params.append(jax.random.uniform(
            keys[2 * idx + 1], (fan_out,), jnp.float32, -bound, bound))
    return tuple(params)


# ----------------------------------------------------------------------------
# Pure-JAX reference for validation.
# ----------------------------------------------------------------------------
def reference(params, query, key, value, num_head, dd_hidden):
    B, S, D = query.shape
    Wq, bq, Wk, bk, Wv, bv, Wo, bo = params

    def proj(x, W, b):
        return (x @ W + b).reshape(B, S, num_head, dd_hidden).transpose(0, 2, 1, 3)

    q, k, v = proj(query, Wq, bq), proj(key, Wk, bk), proj(value, Wv, bv)
    s = jnp.einsum("bhqd,bhkd->bhqk", q, k) / math.sqrt(dd_hidden)
    p = jax.nn.softmax(s, axis=-1)
    o = jnp.einsum("bhqk,bhkd->bhqd", p, v)
    x = o.transpose(0, 2, 1, 3).reshape(B, S, num_head * dd_hidden)
    return x @ Wo + bo, p


if __name__ == "__main__":
    B, S, d_model = 2, 8, 32
    num_head, dd_hidden = 4, 8

    root = jax.random.PRNGKey(0)
    k_params, k_q, k_k, k_v = jax.random.split(root, 4)
    params = init_params(k_params, d_model, dd_hidden, num_head)

    query = jax.random.normal(k_q, (B, S, d_model), jnp.float32)
    key = jax.random.normal(k_k, (B, S, d_model), jnp.float32)
    value = jax.random.normal(k_v, (B, S, d_model), jnp.float32)

    # Tolerance is slightly loosened vs f32-exact because the softmax uses the
    # EUP approximate reciprocal.
    RTOL = ATOL = 5e-3

    # 1) General path: distinct query / key / value.
    out, attn = multi_head_attention(params, query, key, value, num_head, dd_hidden)
    out = jax.block_until_ready(out)
    attn = jax.block_until_ready(attn)
    ref_out, ref_attn = reference(params, query, key, value, num_head, dd_hidden)
    assert out.shape == (B, S, d_model) and attn.shape == (B, num_head, S, S)
    assert jnp.allclose(out, ref_out, rtol=RTOL, atol=ATOL)
    assert jnp.allclose(attn, ref_attn, rtol=RTOL, atol=ATOL)

    # 2) Self-attention path: exercises the fused QKV projection.
    out_sa, attn_sa = multi_head_attention(params, query, query, query,
                                           num_head, dd_hidden)
    out_sa = jax.block_until_ready(out_sa)
    attn_sa = jax.block_until_ready(attn_sa)
    ref_out_sa, ref_attn_sa = reference(params, query, query, query,
                                        num_head, dd_hidden)
    assert jnp.allclose(out_sa, ref_out_sa, rtol=RTOL, atol=ATOL)
    assert jnp.allclose(attn_sa, ref_attn_sa, rtol=RTOL, atol=ATOL)

    print("KERNEL_OK")
</pallas_src>

<mosaic_0001>
module attributes {stable_mosaic.version = 11 : i64} {
  func.func @_linear_kernel(%arg0: i32, %arg1: i32, %arg2: i32, %arg3: memref<16x32xf32, #tpu.memory_space<vmem>>, %arg4: memref<32x32xf32, #tpu.memory_space<vmem>>, %arg5: memref<1x32xf32, #tpu.memory_space<vmem>>, %arg6: memref<16x32xf32, #tpu.memory_space<vmem>>, %arg7: memref<16x32xf32, #tpu.memory_space<vmem>>) attributes {dimension_semantics = [#tpu.dimension_semantics<parallel>, #tpu.dimension_semantics<parallel>, #tpu.dimension_semantics<arbitrary>], iteration_bounds = array<i64: 1, 1, 1>, scalar_prefetch = 0 : i64, scratch_operands = 1 : i64, tpu.core_type = #tpu.core_type<tc>, window_params = [{transform_indices = @transform_0, window_bounds = array<i64: 16, 32>}, {transform_indices = @transform_1, window_bounds = array<i64: 32, 32>}, {transform_indices = @transform_2, window_bounds = array<i64: 1, 32>}, {transform_indices = @transform_3, window_bounds = array<i64: 16, 32>}]} {
    %c0_i32 = arith.constant 0 : i32
    %0 = arith.cmpi eq, %arg2, %c0_i32 : i32
    %1 = arith.extui %0 : i1 to i32
    %c0_i32_0 = arith.constant 0 : i32
    %2 = arith.cmpi ne, %1, %c0_i32_0 : i32
    scf.if %2 {
      %cst_10 = arith.constant 0.000000e+00 : f32
      %12 = vector.broadcast %cst_10 : f32 to vector<16x32xf32>
      %c0_11 = arith.constant 0 : index
      %c0_12 = arith.constant 0 : index
      %13 = vector.load %arg7[%c0_11, %c0_12] : memref<16x32xf32, #tpu.memory_space<vmem>>, vector<16x32xf32>
      tpu.vector_store %arg7[%c0_11, %c0_12], %12 {strides = array<i32>} : memref<16x32xf32, #tpu.memory_space<vmem>>, vector<16x32xf32>,
    } else {
    }
    %c0 = arith.constant 0 : index
    %c0_1 = arith.constant 0 : index
    %3 = vector.load %arg7[%c0, %c0_1] : memref<16x32xf32, #tpu.memory_space<vmem>>, vector<16x32xf32>
    %c0_2 = arith.constant 0 : index
    %c0_3 = arith.constant 0 : index
    %4 = vector.load %arg3[%c0_2, %c0_3] : memref<16x32xf32, #tpu.memory_space<vmem>>, vector<16x32xf32>
    %c0_4 = arith.constant 0 : index
    %c0_5 = arith.constant 0 : index
    %5 = vector.load %arg4[%c0_4, %c0_5] : memref<32x32xf32, #tpu.memory_space<vmem>>, vector<32x32xf32>
    %cst = arith.constant dense<0.000000e+00> : vector<16x32xf32>
    %6 = tpu.matmul %4, %5, %cst {dimension_numbers = #tpu.dot_dimension_numbers<[1], [0], [0], [1], [0, 0, 1, 1], [], []>} : vector<16x32xf32>, vector<32x32xf32>, vector<16x32xf32> -> vector<16x32xf32>
    %7 = arith.addf %3, %6 : vector<16x32xf32>
    %c0_6 = arith.constant 0 : index
    %c0_7 = arith.constant 0 : index
    %8 = vector.load %arg7[%c0_6, %c0_7] : memref<16x32xf32, #tpu.memory_space<vmem>>, vector<16x32xf32>
    tpu.vector_store %arg7[%c0_6, %c0_7], %7 {strides = array<i32>} : memref<16x32xf32, #tpu.memory_space<vmem>>, vector<16x32xf32>,
    %c0_i32_8 = arith.constant 0 : i32
    %9 = arith.cmpi eq, %arg2, %c0_i32_8 : i32
    %10 = arith.extui %9 : i1 to i32
    %c0_i32_9 = arith.constant 0 : i32
    %11 = arith.cmpi ne, %10, %c0_i32_9 : i32
    scf.if %11 {
      %c0_10 = arith.constant 0 : index
      %c0_11 = arith.constant 0 : index
      %12 = vector.load %arg7[%c0_10, %c0_11] : memref<16x32xf32, #tpu.memory_space<vmem>>, vector<16x32xf32>
      %c0_12 = arith.constant 0 : index
      %c0_13 = arith.constant 0 : index
      %13 = vector.load %arg5[%c0_12, %c0_13] : memref<1x32xf32, #tpu.memory_space<vmem>>, vector<1x32xf32>
      %14 = vector.broadcast %13 : vector<1x32xf32> to vector<16x32xf32>
      %15 = arith.addf %12, %14 : vector<16x32xf32>
      %c0_14 = arith.constant 0 : index
      %c0_15 = arith.constant 0 : index
      %16 = vector.load %arg6[%c0_14, %c0_15] : memref<16x32xf32, #tpu.memory_space<vmem>>, vector<16x32xf32>
      tpu.vector_store %arg6[%c0_14, %c0_15], %15 {strides = array<i32>} : memref<16x32xf32, #tpu.memory_space<vmem>>, vector<16x32xf32>,
    } else {
    }
    return
  }
  func.func @transform_0(%arg0: i32, %arg1: i32, %arg2: i32) -> (i32, i32) {
    %c0_i32 = arith.constant 0 : i32
    return %arg0, %arg2 : i32, i32
  }
  func.func @transform_1(%arg0: i32, %arg1: i32, %arg2: i32) -> (i32, i32) {
    %c0_i32 = arith.constant 0 : i32
    return %arg2, %arg1 : i32, i32
  }
  func.func @transform_2(%arg0: i32, %arg1: i32, %arg2: i32) -> (i32, i32) {
    %c0_i32 = arith.constant 0 : i32
    %c0_i32_0 = arith.constant 0 : i32
    return %c0_i32, %arg1 : i32, i32
  }
  func.func @transform_3(%arg0: i32, %arg1: i32, %arg2: i32) -> (i32, i32) {
    %c0_i32 = arith.constant 0 : i32
    return %arg0, %arg1 : i32, i32
  }
}

</mosaic_0001>

<bundles_post_ra>
// kernel: tpu_custom_call.1
= control target key start
LH: loop header
LB: loop body
LE: loop exit
PB: predicated region body
PF: predicated region fallthrough
CT: control target
= control target key end

     0   :  { %8 = vsyncpa [#allocation4], 0  ;;  %s275_s0 = inlined_call_operand.hbm [shape: f32[16,32], index: 0, kind: input, shape index: {}]   ;;  %s276_s1 = inlined_call_operand.hbm [shape: f32[32,32], index: 1, kind: input, shape index: {}]   ;;  %s277_s2 = inlined_call_operand.vmem [shape: f32[1,32], index: 2, kind: input, shape index: {}]   ;;  %s278_s3 = inlined_call_operand.hbm [shape: f32[16,32], index: 3, kind: output, shape index: {}]  }
   0x1   :  { %9 = vsyncpa [#allocation7], 0 }
   0x2   :  { %10 = vsyncpa [#allocation5], 0  ;;  %s15_s14 = sshll.u32 %s275_s0, 4  ;;  %s220_s15 = smov [#allocation3]   ;;  %s16_s14 = int_to_ptr.hbm [resolvable:$true] %s15_s14 }
   0x3   :  { %s17_s16 = sshll.u32 %s220_s15, 4  ;;  %s28_s19 = sshll.u32 %s276_s1, 4  ;;  %s18_s16 = int_to_ptr.vmem [resolvable:$true] %s17_s16  ;;  %s29_s19 = int_to_ptr.hbm [resolvable:$true] %s28_s19 }
   0x4   :  { %s221_s20 = smov 128   ;;  %s222_s21 = smov 8  }
   0x5   :  { %23 = dma.hbm_to_vmem [thread:$0]  %s16_s14, 256, %s18_s16, [#allocation4], %s221_s20, %s221_s20, %s222_s21  }
   0x6   :  { %s223_s22 = smov [#allocation6]  }
   0x7   :  { %s30_s23 = sshll.u32 %s223_s22, 4  ;;  %s31_s23 = int_to_ptr.vmem [resolvable:$true] %s30_s23 }
   0x8   :  { %36 = dma.hbm_to_vmem [thread:$0]  %s29_s19, 512, %s31_s23, [#allocation7], %s221_s20, %s221_s20, %s222_s21  }
   0x9   :  { %214 = dma.done.wait [#allocation4], 256  }
   0xa   :  { %215 = vsyncadd [#allocation4], 4294967040 }
   0xb   :  { %216 = dma.done.wait [#allocation7], 512  }
   0xc   :  { %217 = vsyncadd [#allocation7], 4294966784  ;;  %vm51_vm0 = vcmask 261120   ;;  %v224_v0 = vmov 0.0   ;;  %v61_v1 = vld [vmem:[#allocation6 + $0x18] sm:$0xff]  ;;  %v60_v2 = vld [vmem:[#allocation6 + $0x10] sm:$0xff] }
   0xd   :  { %52 = vst.msk [vmem:[#allocation2] sm:$0xff] %vm51_vm0, %v224_v0  ;;  %81 = vmatpush.msra.mxu0 %v61_v1  ;;  %131 = vmatpush.msra.mxu1 %v61_v1  ;;  %v59_v3 = vld [vmem:[#allocation6 + $0x8] sm:$0xff]  ;;  %v58_v4 = vld [vmem:[#allocation6] sm:$0xff]  ;;  %v56_v5 = vld [vmem:[#allocation3] sm:$0xff]  ;;  %s225_s24 = smov [#allocation8]   ;;  %s115_s28 = sshll.u32 %s278_s3, 4  ;;  %s116_s28 = int_to_ptr.hbm [resolvable:$true] %s115_s28 }
   0xe   :  { %53 = vst.msk [vmem:[#allocation2 + $0x8] sm:$0xff] %vm51_vm0, %v224_v0  ;;  %v57_v6 = vld [vmem:[#allocation3 + $0x8] sm:$0xff]  ;;  %v141_v13 = vld [vmem:[%s277_s2] ss:$0 sm:$0xff]  ;;  %s113_s25 = sshll.u32 %s225_s24, 4  ;;  %s114_s25 = int_to_ptr.vmem [resolvable:$true] %s113_s25 }
   0xf   :  { %82 = vmatpush.msra.mxu0 %v60_v2  ;;  %132 = vmatpush.msra.mxu1 %v60_v2 }
  0x11   :  { %83 = vmatpush.msra.mxu0 %v59_v3  ;;  %133 = vmatpush.msra.mxu1 %v59_v3 }
  0x13   :  { %84 = vmatpush.msra.mxu0 %v58_v4  ;;  %134 = vmatpush.msra.mxu1 %v58_v4 }
  0x14   :  { %129 = vmatmul.msk.f32.vlgmr.msra.gmra.mxu0 %vm51_vm0, %v56_v5  ;;  %130 = vmatmul.msk.f32.vlgmr.msra.gmra.mxu1 %vm51_vm0, %v57_v6  ;;  %v54_v7 = vld [vmem:[#allocation2] sm:$0xff] }
  0x15   :  { %v55_v8 = vld [vmem:[#allocation2 + $0x8] sm:$0xff] }
  0x91   :  { %v86_v9 = vpop.f32.mrf.mxu0  ;;  %v89_v10 = vpop.f32.mrf.mxu1 }
  0x92   :  { %v92_v11 = vadd.f32 %v86_v9, %v54_v7  ;;  %v93_v12 = vadd.f32 %v89_v10, %v55_v8 }
  0x94   :  { %94 = vst.msk [vmem:[#allocation2] sm:$0xff] %vm51_vm0, %v92_v11 }
  0x95   :  { %95 = vst.msk [vmem:[#allocation2 + $0x8] sm:$0xff] %vm51_vm0, %v93_v12 }
  0x9b   :  { %v99_v14 = vld [vmem:[#allocation2] sm:$0xff] }
  0x9c   :  { %v100_v15 = vld [vmem:[#allocation2 + $0x8] sm:$0xff]  ;;  %v105_v16 = vadd.f32 %v141_v13, %v99_v14 }
  0x9d   :  { %v106_v17 = vadd.f32 %v141_v13, %v100_v15 }
  0x9e   :  { %107 = vst.msk [vmem:[#allocation8] sm:$0xff] %vm51_vm0, %v105_v16 }
  0x9f   :  { %108 = vst.msk [vmem:[#allocation8 + $0x8] sm:$0xff] %vm51_vm0, %v106_v17 }
  0xa0   :  { %121 = dma.vmem_to_hbm [thread:$0]  %s114_s25, 256, %s116_s28, [#allocation5], %s221_s20, %s221_s20, %s222_s21  }
  0xa1   :  { %218 = dma.done.wait [#allocation5], 256  }
  0xa2   :  { %219 = vsyncadd [#allocation5], 4294967040 }
  0xa3   :  { %126 = vsyncpa [#allocation4], 1 }
  0xa4   :  { %127 = vsyncpa [#allocation7], 1 }
  0xa5   :  { %128 = vsyncpa [#allocation5], 1 }

</bundles_post_ra>
